<compile_context>
chip_gen: v5e
topology: v5e:2x2
jax: 0.10.0
libtpu: 0.0.40
codegen_flags: <defaults>
</compile_context>

<pallas_src>
import functools

import jax
import jax.numpy as jnp
from jax import lax
from jax.experimental import pallas as pl
from jax.experimental.pallas import tpu as pltpu

_EPS = 1e-6   # PairwiseDistance eps, added to the per-coordinate difference
_BIG = 3.0e38  # "infinity" for masked len1 columns / running-min init


def _dist_kernel(c1_ref, c2_ref, out_ref, minsq_ref, *,
                 tb, t1, t2, dim, len1, len2, mask_len1, mask_len2):
    # c1_ref : (tb, dim, t1)  contour1 tile, len1 on lanes
    # c2_ref : (tb, t2, dim)  contour2 tile, len2 on sublanes
    # out_ref: (tb, 1)        per-batch result block (resident across j, k)
    # minsq_ref: (tb, t2, 1)  running min of squared distances over len1 tiles
    k2 = pl.program_id(1)          # len2 tile index
    k1 = pl.program_id(2)          # len1 tile index (reduction axis, innermost)
    nk1 = pl.num_programs(2)

    @pl.when((k2 == 0) & (k1 == 0))
    def _init_out():
        out_ref[...] = jnp.zeros_like(out_ref)

    @pl.when(k1 == 0)
    def _init_min():
        minsq_ref[...] = jnp.full(minsq_ref.shape, _BIG, jnp.float32)

    if mask_len1:
        col = lax.broadcasted_iota(jnp.int32, (t2, t1), 1)
        col_ok = (k1 * t1 + col) < len1          # valid len1 columns in this tile

    for b in range(tb):                           # static unroll over batches
        acc = None
        for d in range(dim):                      # static unroll over coordinates
            row1 = c1_ref[b, d:d + 1, :].astype(jnp.float32) + _EPS   # (1, t1)
            col2 = c2_ref[b, :, d:d + 1].astype(jnp.float32)          # (t2, 1)
            diff = row1 - col2                                        # (t2, t1)
            sq = diff * diff
            acc = sq if acc is None else acc + sq
        if mask_len1:
            acc = jnp.where(col_ok, acc, _BIG)
        tile_min = jnp.min(acc, axis=-1, keepdims=True)               # (t2, 1)
        minsq_ref[b] = jnp.minimum(minsq_ref[b], tile_min)

    @pl.when(k1 == nk1 - 1)
    def _finalize():
        mind = jnp.sqrt(minsq_ref[...])                               # (tb, t2, 1)
        if mask_len2:
            row = lax.broadcasted_iota(jnp.int32, (t2, 1), 0)
            ok = (k2 * t2 + row) < len2                               # (t2, 1)
            mind = jnp.where(ok[None, :, :], mind, 0.0)
        # accumulate this len2 tile's contribution to the mean (true len2 divisor)
        out_ref[...] += jnp.sum(mind, axis=1) * jnp.float32(1.0 / len2)


def dist_distance(contour1, contour2, resolution, *, t1_max=512, t2_max=256):
    """Pallas implementation of DistDistance.forward. Returns (B,) float32."""
    B, len1, dim = contour1.shape
    B2, len2, dim2 = contour2.shape
    assert B == B2 and dim == dim2, "contour batch / coordinate dims must match"

    # Batch tiling: whole batch per step if small, else 8-batch blocks.
    if B <= 8:
        tb, b_pad = B, B
    else:
        tb = 8
        b_pad = -(-B // 8) * 8

    # len1 tiling (lane axis of the pairwise tile): full if small, else 128-aligned.
    if len1 <= t1_max:
        t1, len1_pad = len1, len1
    else:
        t1 = t1_max
        len1_pad = -(-len1 // t1) * t1

    # len2 tiling (sublane axis): full if small, else 8-aligned tiles.
    if len2 <= t2_max:
        t2, len2_pad = len2, len2
    else:
        t2 = t2_max
        len2_pad = -(-len2 // t2) * t2

    # Layout plumbing (wrapper-side, no extra compute):
    #   contour1 -> (B, dim, len1) so len1 maps to lanes,
    #   contour2 stays (B, len2, dim) so len2 maps to sublanes.
    # Zero-pad; padded cols/rows are masked inside the kernel.
    c1t = jnp.transpose(contour1, (0, 2, 1))
    c1t = jnp.pad(c1t, ((0, b_pad - B), (0, 0), (0, len1_pad - len1)))
    c2p = jnp.pad(contour2, ((0, b_pad - B), (0, len2_pad - len2), (0, 0)))

    grid = (b_pad // tb, len2_pad // t2, len1_pad // t1)

    kernel = functools.partial(
        _dist_kernel, tb=tb, t1=t1, t2=t2, dim=dim, len1=len1, len2=len2,
        mask_len1=(len1_pad != len1), mask_len2=(len2_pad != len2))

    out = pl.pallas_call(
        kernel,
        out_shape=jax.ShapeDtypeStruct((b_pad, 1), jnp.float32),
        grid=grid,
        in_specs=[
            pl.BlockSpec((tb, dim, t1), lambda b, j, k: (b, 0, k)),  # contour1 tile
            pl.BlockSpec((tb, t2, dim), lambda b, j, k: (b, j, 0)),  # contour2 tile
        ],
        out_specs=pl.BlockSpec((tb, 1), lambda b, j, k: (b, 0)),
        scratch_shapes=[pltpu.VMEM((tb, t2, 1), jnp.float32)],
        compiler_params=pltpu.CompilerParams(
            dimension_semantics=("parallel", "arbitrary", "arbitrary")),
    )(c1t, c2p)

    # Resolution scale folded outside the kernel (essentially free on a (B,) vector).
    res = jnp.asarray(resolution, jnp.float32)
    return out[:B, 0] * res


def _reference(contour1, contour2, resolution):
    diff = contour1[:, None, :, :] - contour2[:, :, None, :] + _EPS  # (B, len2, len1, dim)
    dist = jnp.sqrt(jnp.sum(diff * diff, axis=-1))                   # (B, len2, len1)
    return jnp.mean(jnp.min(dist, axis=2), axis=1) * jnp.float32(resolution)


if __name__ == "__main__":
    key = jax.random.PRNGKey(0)
    ka, kb, kc, kd = jax.random.split(key, 4)

    # Case 1: small contours -> whole batch in a single grid step.
    B, len1, len2, dim = 2, 16, 24, 2
    c1 = jax.random.uniform(ka, (B, len1, dim), dtype=jnp.float32)
    c2 = jax.random.uniform(kb, (B, len2, dim), dtype=jnp.float32)
    resolution = 0.5
    out = jax.block_until_ready(dist_distance(c1, c2, resolution))
    ref = _reference(c1, c2, resolution)
    assert out.shape == (B,)
    assert jnp.allclose(out, ref, atol=1e-5, rtol=1e-5), (out, ref)

    # Case 2: force the tiled path (len1/len2 tiling + padding masks) at small sizes.
    B, len1, len2, dim = 3, 200, 20, 2
    c1 = jax.random.uniform(kc, (B, len1, dim), dtype=jnp.float32) * 3.0
    c2 = jax.random.uniform(kd, (B, len2, dim), dtype=jnp.float32) * 3.0
    resolution = 1.25
    out = jax.block_until_ready(
        dist_distance(c1, c2, resolution, t1_max=128, t2_max=8))
    ref = _reference(c1, c2, resolution)
    assert out.shape == (B,)
    assert jnp.allclose(out, ref, atol=1e-5, rtol=1e-5), (out, ref)

    print("KERNEL_OK")
</pallas_src>

<mosaic_0001>
module attributes {stable_mosaic.version = 11 : i64} {
  func.func @_dist_kernel(%arg0: i32, %arg1: i32, %arg2: i32, %arg3: memref<2x2x16xf32, #tpu.memory_space<vmem>>, %arg4: memref<2x24x2xf32, #tpu.memory_space<vmem>>, %arg5: memref<2x1xf32, #tpu.memory_space<vmem>>, %arg6: memref<2x24x1xf32, #tpu.memory_space<vmem>>) attributes {dimension_semantics = [#tpu.dimension_semantics<parallel>, #tpu.dimension_semantics<arbitrary>, #tpu.dimension_semantics<arbitrary>], iteration_bounds = array<i64: 1, 1, 1>, scalar_prefetch = 0 : i64, scratch_operands = 1 : i64, tpu.core_type = #tpu.core_type<tc>, window_params = [{transform_indices = @transform_0, window_bounds = array<i64: 2, 2, 16>}, {transform_indices = @transform_1, window_bounds = array<i64: 2, 24, 2>}, {transform_indices = @transform_2, window_bounds = array<i64: 2, 1>}]} {
    %c0_i32 = arith.constant 0 : i32
    %0 = arith.cmpi eq, %arg1, %c0_i32 : i32
    %c0_i32_0 = arith.constant 0 : i32
    %1 = arith.cmpi eq, %arg2, %c0_i32_0 : i32
    %2 = arith.andi %0, %1 : i1
    %3 = arith.extui %2 : i1 to i32
    %c0_i32_1 = arith.constant 0 : i32
    %4 = arith.cmpi ne, %3, %c0_i32_1 : i32
    scf.if %4 {
      %cst_45 = arith.constant 0.000000e+00 : f32
      %69 = vector.broadcast %cst_45 : f32 to vector<2x1xf32>
      %c0_46 = arith.constant 0 : index
      %c0_47 = arith.constant 0 : index
      %70 = vector.load %arg5[%c0_46, %c0_47] : memref<2x1xf32, #tpu.memory_space<vmem>>, vector<2x1xf32>
      tpu.vector_store %arg5[%c0_46, %c0_47], %69 {strides = array<i32>} : memref<2x1xf32, #tpu.memory_space<vmem>>, vector<2x1xf32>,
    } else {
    }
    %c0_i32_2 = arith.constant 0 : i32
    %5 = arith.cmpi eq, %arg2, %c0_i32_2 : i32
    %6 = arith.extui %5 : i1 to i32
    %c0_i32_3 = arith.constant 0 : i32
    %7 = arith.cmpi ne, %6, %c0_i32_3 : i32
    scf.if %7 {
      %cst_45 = arith.constant 3.000000e+38 : f32
      %69 = vector.broadcast %cst_45 : f32 to vector<2x24x1xf32>
      %c0_46 = arith.constant 0 : index
      %c0_47 = arith.constant 0 : index
      %c0_48 = arith.constant 0 : index
      %70 = vector.load %arg6[%c0_46, %c0_47, %c0_48] : memref<2x24x1xf32, #tpu.memory_space<vmem>>, vector<2x24x1xf32>
      tpu.vector_store %arg6[%c0_46, %c0_47, %c0_48], %69 {strides = array<i32>} : memref<2x24x1xf32, #tpu.memory_space<vmem>>, vector<2x24x1xf32>,
    } else {
    }
    %c0 = arith.constant 0 : index
    %c0_4 = arith.constant 0 : index
    %c0_5 = arith.constant 0 : index
    %8 = vector.load %arg3[%c0, %c0_4, %c0_5] : memref<2x2x16xf32, #tpu.memory_space<vmem>>, vector<1x1x16xf32>
    %9 = vector.shape_cast %8 : vector<1x1x16xf32> to vector<1x16xf32>
    %cst = arith.constant 9.99999997E-7 : f32
    %10 = vector.broadcast %cst : f32 to vector<1x16xf32>
    %11 = arith.addf %9, %10 : vector<1x16xf32>
    %c0_6 = arith.constant 0 : index
    %c0_7 = arith.constant 0 : index
    %c0_8 = arith.constant 0 : index
    %12 = vector.load %arg4[%c0_6, %c0_7, %c0_8] : memref<2x24x2xf32, #tpu.memory_space<vmem>>, vector<1x24x1xf32>
    %13 = vector.shape_cast %12 : vector<1x24x1xf32> to vector<24x1xf32>
    %14 = vector.broadcast %11 : vector<1x16xf32> to vector<24x16xf32>
    %15 = vector.broadcast %13 : vector<24x1xf32> to vector<24x16xf32>
    %16 = arith.subf %14, %15 : vector<24x16xf32>
    %17 = arith.mulf %16, %16 : vector<24x16xf32>
    %c0_9 = arith.constant 0 : index
    %c1 = arith.constant 1 : index
    %c0_10 = arith.constant 0 : index
    %18 = vector.load %arg3[%c0_9, %c1, %c0_10] : memref<2x2x16xf32, #tpu.memory_space<vmem>>, vector<1x1x16xf32>
    %19 = vector.shape_cast %18 : vector<1x1x16xf32> to vector<1x16xf32>
    %cst_11 = arith.constant 9.99999997E-7 : f32
    %20 = vector.broadcast %cst_11 : f32 to vector<1x16xf32>
    %21 = arith.addf %19, %20 : vector<1x16xf32>
    %c0_12 = arith.constant 0 : index
    %c0_13 = arith.constant 0 : index
    %c1_14 = arith.constant 1 : index
    %22 = vector.load %arg4[%c0_12, %c0_13, %c1_14] : memref<2x24x2xf32, #tpu.memory_space<vmem>>, vector<1x24x1xf32>
    %23 = vector.shape_cast %22 : vector<1x24x1xf32> to vector<24x1xf32>
    %24 = vector.broadcast %21 : vector<1x16xf32> to vector<24x16xf32>
    %25 = vector.broadcast %23 : vector<24x1xf32> to vector<24x16xf32>
    %26 = arith.subf %24, %25 : vector<24x16xf32>
    %27 = arith.mulf %26, %26 : vector<24x16xf32>
    %28 = arith.addf %17, %27 : vector<24x16xf32>
    %cst_15 = arith.constant dense<0x7F800000> : vector<24xf32>
    %29 = vector.multi_reduction <minimumf>, %28, %cst_15 [1] : vector<24x16xf32> to vector<24xf32>
    %30 = vector.shape_cast %29 : vector<24xf32> to vector<24x1xf32>
    %c0_16 = arith.constant 0 : index
    %c0_17 = arith.constant 0 : index
    %c0_18 = arith.constant 0 : index
    %31 = vector.load %arg6[%c0_16, %c0_17, %c0_18] : memref<2x24x1xf32, #tpu.memory_space<vmem>>, vector<1x24x1xf32>
    %32 = vector.shape_cast %31 : vector<1x24x1xf32> to vector<24x1xf32>
    %33 = arith.minimumf %32, %30 : vector<24x1xf32>
    %c0_19 = arith.constant 0 : index
    %c0_20 = arith.constant 0 : index
    %c0_21 = arith.constant 0 : index
    %34 = vector.load %arg6[%c0_19, %c0_20, %c0_21] : memref<2x24x1xf32, #tpu.memory_space<vmem>>, vector<1x24x1xf32>
    %35 = vector.shape_cast %34 : vector<1x24x1xf32> to vector<24x1xf32>
    %36 = vector.shape_cast %33 : vector<24x1xf32> to vector<1x24x1xf32>
    tpu.vector_store %arg6[%c0_19, %c0_20, %c0_21], %36 {strides = array<i32>} : memref<2x24x1xf32, #tpu.memory_space<vmem>>, vector<1x24x1xf32>,
    %c1_22 = arith.constant 1 : index
    %c0_23 = arith.constant 0 : index
    %c0_24 = arith.constant 0 : index
    %37 = vector.load %arg3[%c1_22, %c0_23, %c0_24] : memref<2x2x16xf32, #tpu.memory_space<vmem>>, vector<1x1x16xf32>
    %38 = vector.shape_cast %37 : vector<1x1x16xf32> to vector<1x16xf32>
    %cst_25 = arith.constant 9.99999997E-7 : f32
    %39 = vector.broadcast %cst_25 : f32 to vector<1x16xf32>
    %40 = arith.addf %38, %39 : vector<1x16xf32>
    %c1_26 = arith.constant 1 : index
    %c0_27 = arith.constant 0 : index
    %c0_28 = arith.constant 0 : index
    %41 = vector.load %arg4[%c1_26, %c0_27, %c0_28] : memref<2x24x2xf32, #tpu.memory_space<vmem>>, vector<1x24x1xf32>
    %42 = vector.shape_cast %41 : vector<1x24x1xf32> to vector<24x1xf32>
    %43 = vector.broadcast %40 : vector<1x16xf32> to vector<24x16xf32>
    %44 = vector.broadcast %42 : vector<24x1xf32> to vector<24x16xf32>
    %45 = arith.subf %43, %44 : vector<24x16xf32>
    %46 = arith.mulf %45, %45 : vector<24x16xf32>
    %c1_29 = arith.constant 1 : index
    %c1_30 = arith.constant 1 : index
    %c0_31 = arith.constant 0 : index
    %47 = vector.load %arg3[%c1_29, %c1_30, %c0_31] : memref<2x2x16xf32, #tpu.memory_space<vmem>>, vector<1x1x16xf32>
    %48 = vector.shape_cast %47 : vector<1x1x16xf32> to vector<1x16xf32>
    %cst_32 = arith.constant 9.99999997E-7 : f32
    %49 = vector.broadcast %cst_32 : f32 to vector<1x16xf32>
    %50 = arith.addf %48, %49 : vector<1x16xf32>
    %c1_33 = arith.constant 1 : index
    %c0_34 = arith.constant 0 : index
    %c1_35 = arith.constant 1 : index
    %51 = vector.load %arg4[%c1_33, %c0_34, %c1_35] : memref<2x24x2xf32, #tpu.memory_space<vmem>>, vector<1x24x1xf32>
    %52 = vector.shape_cast %51 : vector<1x24x1xf32> to vector<24x1xf32>
    %53 = vector.broadcast %50 : vector<1x16xf32> to vector<24x16xf32>
    %54 = vector.broadcast %52 : vector<24x1xf32> to vector<24x16xf32>
    %55 = arith.subf %53, %54 : vector<24x16xf32>
    %56 = arith.mulf %55, %55 : vector<24x16xf32>
    %57 = arith.addf %46, %56 : vector<24x16xf32>
    %cst_36 = arith.constant dense<0x7F800000> : vector<24xf32>
    %58 = vector.multi_reduction <minimumf>, %57, %cst_36 [1] : vector<24x16xf32> to vector<24xf32>
    %59 = vector.shape_cast %58 : vector<24xf32> to vector<24x1xf32>
    %c1_37 = arith.constant 1 : index
    %c0_38 = arith.constant 0 : index
    %c0_39 = arith.constant 0 : index
    %60 = vector.load %arg6[%c1_37, %c0_38, %c0_39] : memref<2x24x1xf32, #tpu.memory_space<vmem>>, vector<1x24x1xf32>
    %61 = vector.shape_cast %60 : vector<1x24x1xf32> to vector<24x1xf32>
    %62 = arith.minimumf %61, %59 : vector<24x1xf32>
    %c1_40 = arith.constant 1 : index
    %c0_41 = arith.constant 0 : index
    %c0_42 = arith.constant 0 : index
    %63 = vector.load %arg6[%c1_40, %c0_41, %c0_42] : memref<2x24x1xf32, #tpu.memory_space<vmem>>, vector<1x24x1xf32>
    %64 = vector.shape_cast %63 : vector<1x24x1xf32> to vector<24x1xf32>
    %65 = vector.shape_cast %62 : vector<24x1xf32> to vector<1x24x1xf32>
    tpu.vector_store %arg6[%c1_40, %c0_41, %c0_42], %65 {strides = array<i32>} : memref<2x24x1xf32, #tpu.memory_space<vmem>>, vector<1x24x1xf32>,
    %c0_i32_43 = arith.constant 0 : i32
    %66 = arith.cmpi eq, %arg2, %c0_i32_43 : i32
    %67 = arith.extui %66 : i1 to i32
    %c0_i32_44 = arith.constant 0 : i32
    %68 = arith.cmpi ne, %67, %c0_i32_44 : i32
    scf.if %68 {
      %c0_45 = arith.constant 0 : index
      %c0_46 = arith.constant 0 : index
      %c0_47 = arith.constant 0 : index
      %69 = vector.load %arg6[%c0_45, %c0_46, %c0_47] : memref<2x24x1xf32, #tpu.memory_space<vmem>>, vector<2x24x1xf32>
      %70 = math.sqrt %69 : vector<2x24x1xf32>
      %c0_48 = arith.constant 0 : index
      %c0_49 = arith.constant 0 : index
      %71 = vector.load %arg5[%c0_48, %c0_49] : memref<2x1xf32, #tpu.memory_space<vmem>>, vector<2x1xf32>
      %cst_50 = arith.constant dense<0.000000e+00> : vector<2x1xf32>
      %72 = vector.multi_reduction <add>, %70, %cst_50 [1] : vector<2x24x1xf32> to vector<2x1xf32>
      %cst_51 = arith.constant 0.0416666679 : f32
      %73 = vector.broadcast %cst_51 : f32 to vector<2x1xf32>
      %74 = arith.mulf %72, %73 : vector<2x1xf32>
      %75 = arith.addf %71, %74 : vector<2x1xf32>
      %c0_52 = arith.constant 0 : index
      %c0_53 = arith.constant 0 : index
      %76 = vector.load %arg5[%c0_52, %c0_53] : memref<2x1xf32, #tpu.memory_space<vmem>>, vector<2x1xf32>
      tpu.vector_store %arg5[%c0_52, %c0_53], %75 {strides = array<i32>} : memref<2x1xf32, #tpu.memory_space<vmem>>, vector<2x1xf32>,
    } else {
    }
    return
  }
  func.func @transform_0(%arg0: i32, %arg1: i32, %arg2: i32) -> (i32, i32, i32) {
    %c0_i32 = arith.constant 0 : i32
    %c0_i32_0 = arith.constant 0 : i32
    return %arg0, %c0_i32, %arg2 : i32, i32, i32
  }
  func.func @transform_1(%arg0: i32, %arg1: i32, %arg2: i32) -> (i32, i32, i32) {
    %c0_i32 = arith.constant 0 : i32
    %c0_i32_0 = arith.constant 0 : i32
    return %arg0, %arg1, %c0_i32 : i32, i32, i32
  }
  func.func @transform_2(%arg0: i32, %arg1: i32, %arg2: i32) -> (i32, i32) {
    %c0_i32 = arith.constant 0 : i32
    %c0_i32_0 = arith.constant 0 : i32
    return %arg0, %c0_i32 : i32, i32
  }
}

</mosaic_0001>

<bundles_post_ra>
// kernel: tpu_custom_call.1
= control target key start
LH: loop header
LB: loop body
LE: loop exit
PB: predicated region body
PF: predicated region fallthrough
CT: control target
= control target key end

     0   :  { %v315_v0 = vmov 1   ;;  %v316_v1 = vmov 0   ;;  %vm22_vm0 = vcmask 7168   ;;  %v317_v21 = vmov 3e+38   ;;  %s455_s1 = inlined_call_operand.vmem [shape: f32[2,24,2], index: 1, kind: input, shape index: {}]   ;;  %s456_s0 = inlined_call_operand.vmem [shape: f32[2,2,16], index: 0, kind: input, shape index: {}]   ;;  %s457_s2 = inlined_call_operand.vmem [shape: f32[2,1], index: 2, kind: output, shape index: {}]  }
   0x1   :  { %300 = vset.pattern.permute.xlu1 %v315_v0  ;;  %299 = vset.pattern.permute.xlu0 %v316_v1  ;;  %v31_v2 = vld [vmem:[%s455_s1] sm:$0xff]  ;;  %v291_v3 = vld [vmem:[%s455_s1 + $0x18] sm:$0xff]  ;;  %v32_v4 = vld [vmem:[%s455_s1 + $0x8] sm:$0xff]  ;;  %23 = vst.msk [vmem:[#allocation2] sm:$0xff] %vm22_vm0, %v317_v21  ;;  %vm80_vm1 = vcmask 130048   ;;  %vm17_vm2 = vcmask 1024  }
   0x2   :  { %301 = vset.pattern.permute.xlu2 %v316_v1  ;;  %60 = vperm.xlu1 %300, %v31_v2   ;;  %v292_v5 = vld [vmem:[%s455_s1 + $0x20] sm:$0xff]  ;;  %v33_v6 = vld [vmem:[%s455_s1 + $0x10] sm:$0xff]  ;;  %v293_v7 = vld [vmem:[%s455_s1 + $0x28] sm:$0xff]  ;;  %24 = vst.msk [vmem:[#allocation2 + $0x8] sm:$0xff] %vm22_vm0, %v317_v21  ;;  %vm280_vm15 = vcmask 1041409  }
   0x3   :  { %37 = vperm.xlu0 %299, %v31_v2   ;;  %110 = vperm.xlu2 %301, %v291_v3   ;;  %v56_v8 = vld [vmem:[%s456_s0 + $0x1] sm:$0x1]  ;;  %v29_v9 = vld [vmem:[%s456_s0] sm:$0x1]  ;;  %v290_v22 = vld [vmem:[%s456_s0 + $0x2] sm:$0x1] }
   0x4   :  { %v57_v11 = vadd.f32 1e-06, %v56_v8  ;;  %v30_v12 = vadd.f32 1e-06, %v29_v9  ;;  %25 = vst.msk [vmem:[#allocation2 + $0x10] sm:$0xff] %vm22_vm0, %v317_v21 }
   0x5   :  { %v294_v25 = vld [vmem:[%s456_s0 + $0x3] sm:$0x1]  ;;  %26 = vst.msk [vmem:[#allocation2 + $0x18] sm:$0xff] %vm22_vm0, %v317_v21  ;;  %v102_v26 = vadd.f32 1e-06, %v290_v22 }
   0x6   :  { %v58_v13 = vperm.slane %v57_v11, 0  ;;  %v34_v14 = vperm.slane %v30_v12, 0  ;;  %27 = vst.msk [vmem:[#allocation2 + $0x20] sm:$0xff] %vm22_vm0, %v317_v21  ;;  %v130_v31 = vadd.f32 1e-06, %v294_v25 }
   0x7   :  { %28 = vst.msk [vmem:[#allocation2 + $0x28] sm:$0xff] %vm22_vm0, %v317_v21  ;;  %v107_v33 = vperm.slane %v102_v26, 0 }
   0x8   :  { %v131_v37 = vperm.slane %v130_v31, 0 }
   0x9   :  { %v91_v8 = vld [vmem:[#allocation2 + $0x8] sm:$0xff] }
   0xa   :  { %64 = vperm.xlu1 %300, %v32_v4  }
   0xb   :  { %42 = vperm.xlu0 %299, %v32_v4   ;;  %115 = vperm.xlu2 %301, %v292_v5  }
   0xd   :  { %v164_v12 = vld [vmem:[#allocation2 + $0x20] sm:$0xff] }
  0x12   :  { %137 = vperm.xlu1 %300, %v292_v5   ;;  %v90_v5 = vld [vmem:[#allocation2] sm:$0xff] }
  0x13   :  { %302 = vset.pattern.permute.xlu0 %v315_v0  ;;  %47 = vperm.xlu2 %301, %v33_v6  }
  0x14   :  { %133 = vperm.xlu0 %302, %v291_v3  }
  0x1a   :  { %68 = vperm.xlu1 %300, %v33_v6  }
  0x1b   :  { %120 = vperm.xlu2 %301, %v293_v7  }
  0x1c   :  { %141 = vperm.xlu0 %302, %v293_v7  }
  0x5d   :  { %v111_v10 = vpop.permute.xlu2 %110 }
  0x5e   :  { %v123_v42 = vsub.f32 %v107_v33, %v111_v10 }
  0x60   :  { %v126_v48 = vmul.f32 %v123_v42, %v123_v42 }
  0x65   :  { %v116_v18 = vpop.permute.xlu2 %115 }
  0x66   :  { %v124_v39 = vsub.f32 %v107_v33, %v116_v18 }
  0x68   :  { %v127_v45 = vmul.f32 %v124_v39, %v124_v39 }
  0x6d   :  { %v48_v35 = vpop.permute.xlu2 %47 }
  0x6e   :  { %v52_v52 = vsub.f32 %v34_v14, %v48_v35 }
  0x70   :  { %v55_v60 = vmul.f32 %v52_v52, %v52_v52 }
  0x74   :  { %v61_v15 = vpop.permute.xlu1 %60 }
  0x75   :  { %v71_v16 = vsub.f32 %v58_v13, %v61_v15  ;;  %v38_v17 = vpop.permute.xlu0 %37  ;;  %v121_v51 = vpop.permute.xlu2 %120 }
  0x76   :  { %v50_v19 = vsub.f32 %v34_v14, %v38_v17  ;;  %v125_v56 = vsub.f32 %v107_v33, %v121_v51 }
  0x77   :  { %v74_v20 = vmul.f32 %v71_v16, %v71_v16 }
  0x78   :  { %v53_v23 = vmul.f32 %v50_v19, %v50_v19  ;;  %v128_v63 = vmul.f32 %v125_v56, %v125_v56 }
  0x7a   :  { %v77_v24 = vadd.f32 %v74_v20, %v53_v23  ;;  %v92_v20 = vld [vmem:[#allocation2 + $0x10] sm:$0xff]  ;;  %v165_v23 = vld [vmem:[#allocation2 + $0x28] sm:$0xff] }
  0x7c   :  { %v65_v27 = vpop.permute.xlu1 %64  ;;  %v81_v28 = vsel %vm80_vm1, %v77_v24, inf }
  0x7d   :  { %v72_v29 = vsub.f32 %v58_v13, %v65_v27  ;;  %v43_v30 = vpop.permute.xlu0 %42  ;;  %82 = vmin.xlane.f32.xlu1 %v81_v28 }
  0x7e   :  { %v51_v32 = vsub.f32 %v34_v14, %v43_v30 }
  0x7f   :  { %v75_v34 = vmul.f32 %v72_v29, %v72_v29 }
  0x80   :  { %v54_v36 = vmul.f32 %v51_v32, %v51_v32 }
  0x82   :  { %v78_v38 = vadd.f32 %v75_v34, %v54_v36 }
  0x84   :  { %v138_v40 = vpop.permute.xlu1 %137  ;;  %v84_v41 = vsel %vm80_vm1, %v78_v38, inf }
  0x85   :  { %v145_v43 = vsub.f32 %v131_v37, %v138_v40  ;;  %85 = vmin.xlane.f32.xlu2 %v84_v41 }
  0x86   :  { %v134_v44 = vpop.permute.xlu0 %133 }
  0x87   :  { %v148_v46 = vmul.f32 %v145_v43, %v145_v43  ;;  %v144_v47 = vsub.f32 %v131_v37, %v134_v44 }
  0x89   :  { %v147_v49 = vmul.f32 %v144_v47, %v144_v47  ;;  %v151_v50 = vadd.f32 %v148_v46, %v127_v45  ;;  %v318_v46 = vmov 0.0  }
  0x8a   :  { %18 = vst.msk [vmem:[%s457_s2] sm:$0x3] %vm17_vm2, %v318_v46 }
  0x8b   :  { %v156_v53 = vsel %vm80_vm1, %v151_v50, inf  ;;  %v150_v54 = vadd.f32 %v147_v49, %v126_v48 }
  0x8c   :  { %v69_v55 = vpop.permute.xlu1 %68 }
  0x8d   :  { %v73_v57 = vsub.f32 %v58_v13, %v69_v55  ;;  %157 = vmin.xlane.f32.xlu2 %v156_v53  ;;  %v153_v58 = vsel %vm80_vm1, %v150_v54, inf  ;;  %v163_v13 = vld [vmem:[#allocation2 + $0x18] sm:$0xff] }
  0x8e   :  { %v142_v59 = vpop.permute.xlu0 %141  ;;  %154 = vmin.xlane.f32.xlu0 %v153_v58 }
  0x8f   :  { %v76_v61 = vmul.f32 %v73_v57, %v73_v57  ;;  %v146_v62 = vsub.f32 %v131_v37, %v142_v59 }
  0x91   :  { %v149_v0 = vmul.f32 %v146_v62, %v146_v62  ;;  %v79_v1 = vadd.f32 %v76_v61, %v55_v60 }
  0x93   :  { %v87_v2 = vsel %vm80_vm1, %v79_v1, inf  ;;  %v152_v3 = vadd.f32 %v149_v0, %v128_v63 }
  0x94   :  { %88 = vmin.xlane.f32.xlu1 %v87_v2 }
  0x95   :  { %v159_v4 = vsel %vm80_vm1, %v152_v3, inf }
  0x96   :  { %160 = vmin.xlane.f32.xlu2 %v159_v4 }
  0xf0   :  { %v83_v6 = vpop.xlane.xlu1 %82 }
  0xf1   :  { %v93_v7 = vmin.f32 %v90_v5, %v83_v6 }
  0xf3   :  { %97 = vst.msk [vmem:[#allocation2] sm:$0xff] %vm22_vm0, %v93_v7 }
  0xf8   :  { %v86_v9 = vpop.xlane.xlu2 %85 }
  0xf9   :  { %v94_v10 = vmin.f32 %v91_v8, %v86_v9 }
  0xfa   :  { %v377_v11 = vld [vmem:[#allocation2] sm:$0xff] }
  0xfb   :  { %98 = vst.msk [vmem:[#allocation2 + $0x8] sm:$0xff] %vm22_vm0, %v94_v10  ;;  %303 = vrsqrt.f32 %v377_v11  ;;  %vm188_vm3 = vcmp.eq.f32.partialorder %v377_v11, inf  ;;  %vm190_vm4 = vcmp.eq.f32.partialorder %v377_v11, 0.0  ;;  %v191_v61 = vand.u32 2147483648, %v377_v11 }
 0x100   :  { %v158_v14 = vpop.xlane.xlu2 %157 }
 0x101   :  { %v167_v15 = vmin.f32 %v164_v12, %v158_v14  ;;  %v155_v16 = vpop.xlane.xlu0 %154  ;;  %v304_v19 = vpop.eup %303 }
 0x102   :  { %v381_v17 = vld [vmem:[#allocation2 + $0x8] sm:$0xff]  ;;  %v166_v18 = vmin.f32 %v163_v13, %v155_v16  ;;  %v182_v21 = vmul.f32 %v304_v19, %v377_v11 }
 0x103   :  { %305 = vrsqrt.f32 %v381_v17  ;;  %170 = vst.msk [vmem:[#allocation2 + $0x20] sm:$0xff] %vm22_vm0, %v167_v15  ;;  %vm200_vm5 = vcmp.eq.f32.partialorder %v381_v17, inf  ;;  %vm202_vm6 = vcmp.eq.f32.partialorder %v381_v17, 0.0  ;;  %v203_v4 = vand.u32 2147483648, %v381_v17 }
 0x104   :  { %169 = vst.msk [vmem:[#allocation2 + $0x18] sm:$0xff] %vm22_vm0, %v166_v18  ;;  %v183_v27 = vmul.f32 %v304_v19, %v182_v21 }
 0x106   :  { %v184_v33 = vmul.f32 0.5, %v183_v27 }
 0x107   :  { %v89_v22 = vpop.xlane.xlu1 %88 }
 0x108   :  { %v95_v24 = vmin.f32 %v92_v20, %v89_v22  ;;  %v185_v39 = vsub.f32 1.5, %v184_v33 }
 0x109   :  { %v306_v25 = vpop.eup %305  ;;  %v161_v26 = vpop.xlane.xlu2 %160 }
 0x10a   :  { %v194_v28 = vmul.f32 %v306_v25, %v381_v17  ;;  %v388_v29 = vld [vmem:[#allocation2 + $0x20] sm:$0xff]  ;;  %99 = vst.msk [vmem:[#allocation2 + $0x10] sm:$0xff] %vm22_vm0, %v95_v24  ;;  %v168_v30 = vmin.f32 %v165_v23, %v161_v26  ;;  %v186_v47 = vmul.f32 %v304_v19, %v185_v39 }
 0x10b   :  { %307 = vrsqrt.f32 %v388_v29  ;;  %v392_v31 = vld [vmem:[#allocation2 + $0x18] sm:$0xff]  ;;  %vm236_vm7 = vcmp.eq.f32.partialorder %v388_v29, inf  ;;  %vm238_vm9 = vcmp.eq.f32.partialorder %v388_v29, 0.0  ;;  %v239_v10 = vand.u32 2147483648, %v388_v29 }
 0x10c   :  { %v195_v32 = vmul.f32 %v306_v25, %v194_v28  ;;  %309 = vrsqrt.f32 %v392_v31  ;;  %171 = vst.msk [vmem:[#allocation2 + $0x28] sm:$0xff] %vm22_vm0, %v168_v30  ;;  %v187_v56 = vmul.f32 %v186_v47, %v377_v11  ;;  %vm224_vm8 = vcmp.eq.f32.partialorder %v392_v31, inf }
 0x10d   :  { %v227_v12 = vand.u32 2147483648, %v392_v31  ;;  %vm226_vm10 = vcmp.eq.f32.partialorder %v392_v31, 0.0 }
 0x10e   :  { %v196_v34 = vmul.f32 0.5, %v195_v32  ;;  %v189_v3 = vsel %vm188_vm3, %v377_v11, %v187_v56 }
 0x10f   :  { %v192_v13 = vsel %vm190_vm4, %v191_v61, %v189_v3 }
 0x110   :  { %v197_v36 = vsub.f32 1.5, %v196_v34  ;;  %v254_v21 = vsel %vm22_vm0, %v192_v13, 0.0 }
 0x111   :  { %v308_v35 = vpop.eup %307  ;;  %v396_v37 = vld [vmem:[#allocation2 + $0x10] sm:$0xff] }
 0x112   :  { %v310_v38 = vpop.eup %309  ;;  %v230_v40 = vmul.f32 %v308_v35, %v388_v29  ;;  %311 = vrsqrt.f32 %v396_v37  ;;  %v198_v44 = vmul.f32 %v306_v25, %v197_v36  ;;  %vm212_vm11 = vcmp.eq.f32.partialorder %v396_v37, inf }
 0x113   :  { %v218_v41 = vmul.f32 %v310_v38, %v392_v31  ;;  %v401_v42 = vld [vmem:[#allocation2 + $0x28] sm:$0xff]  ;;  %vm214_vm12 = vcmp.eq.f32.partialorder %v396_v37, 0.0  ;;  %v215_v11 = vand.u32 2147483648, %v396_v37 }
 0x114   :  { %v231_v43 = vmul.f32 %v308_v35, %v230_v40  ;;  %313 = vrsqrt.f32 %v401_v42  ;;  %v199_v52 = vmul.f32 %v198_v44, %v381_v17  ;;  %vm248_vm13 = vcmp.eq.f32.partialorder %v401_v42, inf }
 0x115   :  { %v219_v45 = vmul.f32 %v310_v38, %v218_v41  ;;  %v251_v28 = vand.u32 2147483648, %v401_v42  ;;  %vm250_vm14 = vcmp.eq.f32.partialorder %v401_v42, 0.0 }
 0x116   :  { %v232_v48 = vmul.f32 0.5, %v231_v43  ;;  %v201_v63 = vsel %vm200_vm5, %v381_v17, %v199_v52 }
 0x117   :  { %v220_v49 = vmul.f32 0.5, %v219_v45  ;;  %v204_v9 = vsel %vm202_vm6, %v203_v4, %v201_v63 }
 0x118   :  { %v312_v50 = vpop.eup %311  ;;  %v233_v51 = vsub.f32 1.5, %v232_v48  ;;  %v255_v18 = vsel %vm22_vm0, %v204_v9, 0.0 }
 0x119   :  { %v221_v53 = vsub.f32 1.5, %v220_v49  ;;  %v206_v54 = vmul.f32 %v312_v50, %v396_v37  ;;  %v256_v26 = vadd.f32 %v255_v18, %v254_v21 }
 0x11a   :  { %v314_v55 = vpop.eup %313  ;;  %v234_v57 = vmul.f32 %v308_v35, %v233_v51 }
 0x11b   :  { %v222_v58 = vmul.f32 %v310_v38, %v221_v53  ;;  %v207_v59 = vmul.f32 %v312_v50, %v206_v54  ;;  %v242_v60 = vmul.f32 %v314_v55, %v401_v42 }
 0x11c   :  { %v235_v62 = vmul.f32 %v234_v57, %v388_v29 }
 0x11d   :  { %v223_v0 = vmul.f32 %v222_v58, %v392_v31  ;;  %v208_v1 = vmul.f32 0.5, %v207_v59  ;;  %v243_v2 = vmul.f32 %v314_v55, %v242_v60 }
 0x11e   :  { %v237_v5 = vsel %vm236_vm7, %v388_v29, %v235_v62 }
 0x11f   :  { %v225_v6 = vsel %vm224_vm8, %v392_v31, %v223_v0  ;;  %v209_v7 = vsub.f32 1.5, %v208_v1  ;;  %v244_v8 = vmul.f32 0.5, %v243_v2  ;;  %v240_v16 = vsel %vm238_vm9, %v239_v10, %v237_v5 }
 0x120   :  { %v228_v17 = vsel %vm226_vm10, %v227_v12, %v225_v6  ;;  %v266_v22 = vsel %vm22_vm0, %v240_v16, 0.0 }
 0x121   :  { %v210_v14 = vmul.f32 %v312_v50, %v209_v7  ;;  %v245_v15 = vsub.f32 1.5, %v244_v8  ;;  %v265_v23 = vsel %vm22_vm0, %v228_v17, 0.0 }
 0x122   :  { %v267_v31 = vadd.f32 %v266_v22, %v265_v23 }
 0x123   :  { %v211_v19 = vmul.f32 %v210_v14, %v396_v37  ;;  %v246_v20 = vmul.f32 %v314_v55, %v245_v15 }
 0x125   :  { %v213_v24 = vsel %vm212_vm11, %v396_v37, %v211_v19  ;;  %v247_v25 = vmul.f32 %v246_v20, %v401_v42 }
 0x126   :  { %v216_v27 = vsel %vm214_vm12, %v215_v11, %v213_v24 }
 0x127   :  { %v257_v29 = vsel %vm22_vm0, %v216_v27, 0.0  ;;  %v249_v30 = vsel %vm248_vm13, %v401_v42, %v247_v25  ;;  %v253_v42 = vld [vmem:[%s457_s2] sm:$0x3] }
 0x128   :  { %v258_v32 = vadd.f32 %v257_v29, %v256_v26  ;;  %v252_v33 = vsel %vm250_vm14, %v251_v28, %v249_v30 }
 0x129   :  { %v268_v34 = vsel %vm22_vm0, %v252_v33, 0.0 }
 0x12a   :  { %v259_v35 = vrot.slane %v258_v32, 4  ;;  %v269_v36 = vadd.f32 %v268_v34, %v267_v31 }
 0x12c   :  { %v260_v37 = vadd.f32 %v259_v35, %v258_v32  ;;  %v270_v38 = vrot.slane %v269_v36, 4 }
 0x12e   :  { %v261_v39 = vrot.slane %v260_v37, 2  ;;  %v271_v40 = vadd.f32 %v270_v38, %v269_v36 }
 0x130   :  { %v262_v41 = vadd.f32 %v261_v39, %v260_v37  ;;  %v272_v43 = vrot.slane %v271_v40, 2 }
 0x132   :  { %v263_v44 = vrot.slane %v262_v41, 1  ;;  %v273_v45 = vadd.f32 %v272_v43, %v271_v40 }
 0x134   :  { %v264_v46 = vadd.f32 %v263_v44, %v262_v41  ;;  %v274_v47 = vrot.slane %v273_v45, 1 }
 0x136   :  { %v276_v48 = vmul.f32 0.041666668, %v264_v46  ;;  %v275_v49 = vadd.f32 %v274_v47, %v273_v45 }
 0x138   :  { %v277_v50 = vmul.f32 0.041666668, %v275_v49 }
 0x13a   :  { %v281_v51 = vsel %vm280_vm15, %v277_v50, %v276_v48 }
 0x13b   :  { %v283_v52 = vadd.f32 %v281_v51, %v253_v42 }
 0x13d   :  { %285 = vst.msk [vmem:[%s457_s2] sm:$0x3] %vm17_vm2, %v283_v52 }

</bundles_post_ra>
